<compile_context>
chip_gen: v6e
topology: v6e:2x2x1
jax: 0.10.0
libtpu: 0.0.40
codegen_flags: <defaults>
</compile_context>

<pallas_src>
import jax
import jax.numpy as jnp
from jax.experimental import pallas as pl
from jax.experimental.pallas import tpu as pltpu

NUM_CLASSES = 100
NUM_FEATURES = 2


def toy_relu_kernel(m_ref, b_ref, x_ref, o_ref):
    """out = relu(M @ x + bias) for one (C, TB) slab.

    m_ref: (C, C)   M = weights.T @ weights, resident in VMEM
    b_ref: (C, 1)   bias column, resident (broadcasts along lanes)
    x_ref: (C, TB)  input slab, batch on the lane axis
    o_ref: (C, TB)  output slab
    """
    acc = jnp.dot(m_ref[...], x_ref[...], preferred_element_type=jnp.float32)
    o_ref[...] = jnp.maximum(acc + b_ref[...], 0.0).astype(o_ref.dtype)


def _pick_tile(B, tile_b):
    """Largest multiple of 128 that divides B and is <= tile_b (None if impossible)."""
    if B % 128 != 0:
        return None
    t = min(tile_b, B)
    t -= t % 128
    while t > 0 and B % t != 0:
        t -= 128
    return t if t > 0 else None


def toy_model_relu(weights, bias, x, *, tile_b=2048):
    """Forward pass matching ToyModelReLU. x: (C, B) -> out: (C, B)."""
    F_, C = weights.shape
    C_, B = x.shape
    assert C == C_ and bias.shape == (C, 1)

    # Fuse the two matmuls: W.T @ (W @ x) == (W.T @ W) @ x.  M is tiny and
    # stays resident; each grid step is then one well-shaped MXU matmul.
    m = (weights.T @ weights).astype(jnp.float32)           # (C, C)
    bias = bias.astype(jnp.float32)
    x = x.astype(jnp.float32)

    if B <= tile_b:
        # Whole problem fits in one VMEM block: single no-grid invocation,
        # no transposes, no padding.
        return pl.pallas_call(
            toy_relu_kernel,
            out_shape=jax.ShapeDtypeStruct((C, B), jnp.float32),
            in_specs=[
                pl.BlockSpec(memory_space=pltpu.MemorySpace.VMEM),  # M
                pl.BlockSpec(memory_space=pltpu.MemorySpace.VMEM),  # bias
                pl.BlockSpec(memory_space=pltpu.MemorySpace.VMEM),  # x
            ],
            out_specs=pl.BlockSpec(memory_space=pltpu.MemorySpace.VMEM),
        )(m, bias, x)

    # Gridded path: stream (C, tile) slabs of x / out (batch on lanes, so
    # stores are unmasked and lane-dense); M and bias stay resident.
    tile = _pick_tile(B, tile_b)
    pad = 0
    if tile is None:
        # TODO(synk): mask the ragged tail in-kernel instead of padding; this
        # pad/slice round-trip only triggers when B is not a multiple of 128.
        tile = min(tile_b, pl.cdiv(B, 128) * 128)
        Bp = pl.cdiv(B, tile) * tile
        pad = Bp - B
        x = jnp.pad(x, ((0, 0), (0, pad)))
    Bp = x.shape[1]

    out = pl.pallas_call(
        toy_relu_kernel,
        out_shape=jax.ShapeDtypeStruct((C, Bp), jnp.float32),
        grid=(Bp // tile,),
        in_specs=[
            pl.BlockSpec((C, C), lambda i: (0, 0)),        # M, resident
            pl.BlockSpec((C, 1), lambda i: (0, 0)),        # bias, resident
            pl.BlockSpec((C, tile), lambda i: (0, i)),     # x slab streams
        ],
        out_specs=pl.BlockSpec((C, tile), lambda i: (0, i)),
        compiler_params=pltpu.CompilerParams(
            dimension_semantics=("parallel",),             # megacore on v7x
            vmem_limit_bytes=64 << 20,                     # headroom for large tiles
        ),
    )(m, bias, x)
    return out[:, :B] if pad else out


def reference(weights, bias, x):
    hidden = weights @ x
    final = weights.T @ hidden + bias
    return jnp.maximum(final, 0.0)


if __name__ == "__main__":
    key = jax.random.PRNGKey(0)
    kw, kb, kx, kx2 = jax.random.split(key, 4)

    weights = jax.random.normal(kw, (NUM_FEATURES, NUM_CLASSES), dtype=jnp.float32)
    bias = jax.random.normal(kb, (NUM_CLASSES, 1), dtype=jnp.float32)

    # Small batch: exercises the single-block (no-grid) path.
    B_small = 8
    x_small = jax.random.normal(kx, (NUM_CLASSES, B_small), dtype=jnp.float32)
    out_small = jax.block_until_ready(toy_model_relu(weights, bias, x_small))
    ref_small = reference(weights, bias, x_small)
    assert out_small.shape == (NUM_CLASSES, B_small)
    assert jnp.allclose(out_small, ref_small, atol=1e-3, rtol=1e-4), "small-batch mismatch"

    # Gridded path: 2 batch tiles of 256 columns (still a small, fast test).
    B_grid = 512
    x_grid = jax.random.normal(kx2, (NUM_CLASSES, B_grid), dtype=jnp.float32)
    out_grid = jax.block_until_ready(toy_model_relu(weights, bias, x_grid, tile_b=256))
    ref_grid = reference(weights, bias, x_grid)
    assert out_grid.shape == (NUM_CLASSES, B_grid)
    assert jnp.allclose(out_grid, ref_grid, atol=1e-3, rtol=1e-4), "gridded-batch mismatch"

    print("KERNEL_OK")
</pallas_src>

<mosaic_0001>
module attributes {stable_mosaic.version = 11 : i64} {
  func.func @toy_relu_kernel(%arg0: memref<100x100xf32, #tpu.memory_space<vmem>>, %arg1: memref<100x1xf32, #tpu.memory_space<vmem>>, %arg2: memref<100x8xf32, #tpu.memory_space<vmem>>, %arg3: memref<100x8xf32, #tpu.memory_space<vmem>>) attributes {dimension_semantics = [], scalar_prefetch = 0 : i64, scratch_operands = 0 : i64, tpu.core_type = #tpu.core_type<tc>} {
    %c0 = arith.constant 0 : index
    %c0_0 = arith.constant 0 : index
    %0 = vector.load %arg0[%c0, %c0_0] : memref<100x100xf32, #tpu.memory_space<vmem>>, vector<100x100xf32>
    %c0_1 = arith.constant 0 : index
    %c0_2 = arith.constant 0 : index
    %1 = vector.load %arg2[%c0_1, %c0_2] : memref<100x8xf32, #tpu.memory_space<vmem>>, vector<100x8xf32>
    %cst = arith.constant dense<0.000000e+00> : vector<100x8xf32>
    %2 = tpu.matmul %0, %1, %cst {dimension_numbers = #tpu.dot_dimension_numbers<[1], [0], [0], [1], [0, 0, 1, 1], [], []>} : vector<100x100xf32>, vector<100x8xf32>, vector<100x8xf32> -> vector<100x8xf32>
    %c0_3 = arith.constant 0 : index
    %c0_4 = arith.constant 0 : index
    %3 = vector.load %arg1[%c0_3, %c0_4] : memref<100x1xf32, #tpu.memory_space<vmem>>, vector<100x1xf32>
    %4 = vector.broadcast %3 : vector<100x1xf32> to vector<100x8xf32>
    %5 = arith.addf %2, %4 : vector<100x8xf32>
    %cst_5 = arith.constant 0.000000e+00 : f32
    %6 = vector.broadcast %cst_5 : f32 to vector<100x8xf32>
    %7 = arith.maximumf %5, %6 : vector<100x8xf32>
    %c0_6 = arith.constant 0 : index
    %c0_7 = arith.constant 0 : index
    %8 = vector.load %arg3[%c0_6, %c0_7] : memref<100x8xf32, #tpu.memory_space<vmem>>, vector<100x8xf32>
    tpu.vector_store %arg3[%c0_6, %c0_7], %7 {strides = array<i32>} : memref<100x8xf32, #tpu.memory_space<vmem>>, vector<100x8xf32>,
    return
  }
}

</mosaic_0001>

<bundles_post_ra>
// kernel: tpu_custom_call.1
= control target key start
LH: loop header
LB: loop body
LE: loop exit
PB: predicated region body
PF: predicated region fallthrough
CT: control target
= control target key end

     0   :  { %vm158_vm0 = vcmask 1043456   ;;  %v460_v0 = vmov 0.0   ;;  %vm118_vm1 = vcmask 818176   ;;  %vm461_vm2 = vmmov 0   ;;  %s719_s2 = inlined_call_operand.vmem [shape: f32[100,8], index: 2, kind: input, shape index: {}]   ;;  %s720_s0 = inlined_call_operand.vmem [shape: f32[100,100], index: 0, kind: input, shape index: {}]   ;;  %s721_s1 = inlined_call_operand.vmem [shape: f32[100,1], index: 1, kind: input, shape index: {}]   ;;  %s722_s3 = inlined_call_operand.vmem [shape: f32[100,8], index: 3, kind: output, shape index: {}]  }
   0x1   :  { %364 = vmatprep.subr.mxu0 %v460_v0  ;;  %429 = vmatprep.subr.mxu1 %v460_v0  ;;  %v39_v1 = vld [vmem:[%s719_s2 + $0x60] sm:$0xf]  ;;  %v38_v2 = vld [vmem:[%s719_s2 + $0x58] sm:$0xff]  ;;  %v37_v3 = vld [vmem:[%s719_s2 + $0x50] sm:$0xff]  ;;  %v462_v20 = vmov 0   ;;  %vm305_vm3 = vcmask 64512  }
   0x2   :  { %365 = vmatpush3.msk.msra.mxu0 %vm158_vm0, %v39_v1  ;;  %442 = vmatpush3.msk.msra.mxu1 %vm158_vm0, %v39_v1  ;;  %v36_v4 = vld [vmem:[%s719_s2 + $0x48] sm:$0xff]  ;;  %v35_v5 = vld [vmem:[%s719_s2 + $0x40] sm:$0xff]  ;;  %v34_v6 = vld [vmem:[%s719_s2 + $0x38] sm:$0xff]  ;;  %vm318_vm4 = vcmask 60416  }
   0x3   :  { %366 = vmatprep.subr.mxu0 %v460_v0  ;;  %430 = vmatprep.subr.mxu1 %v460_v0  ;;  %v33_v7 = vld [vmem:[%s719_s2 + $0x30] sm:$0xff]  ;;  %v32_v8 = vld [vmem:[%s719_s2 + $0x28] sm:$0xff]  ;;  %v31_v9 = vld [vmem:[%s719_s2 + $0x20] sm:$0xff] }
   0x4   :  { %367 = vmatpush3.msra.mxu0 %v38_v2  ;;  %443 = vmatpush3.msra.mxu1 %v38_v2  ;;  %v30_v10 = vld [vmem:[%s719_s2 + $0x18] sm:$0xff]  ;;  %v29_v11 = vld [vmem:[%s719_s2 + $0x10] sm:$0xff]  ;;  %v28_v12 = vld [vmem:[%s719_s2 + $0x8] sm:$0xff] }
   0x5   :  { %368 = vmatprep.subr.mxu0 %v460_v0  ;;  %431 = vmatprep.subr.mxu1 %v460_v0  ;;  %v27_v13 = vld [vmem:[%s719_s2] sm:$0xff]  ;;  %v21_v15 = vld [vmem:[%s720_s0 + $0x38] sm:$0xff]  ;;  %v42_v17 = vld [vmem:[%s721_s1 + $0x10] sm:$0xff] }
   0x6   :  { %369 = vmatpush3.msra.mxu0 %v37_v3  ;;  %444 = vmatpush3.msra.mxu1 %v37_v3  ;;  %v14_v14 = vld [vmem:[%s720_s0] sm:$0xff]  ;;  %v15_v18 = vld [vmem:[%s720_s0 + $0x8] sm:$0xff]  ;;  %v43_v22 = vld [vmem:[%s721_s1 + $0x18] sm:$0xff] }
   0x7   :  { %370 = vmatprep.subr.mxu0 %v460_v0  ;;  %432 = vmatprep.subr.mxu1 %v460_v0  ;;  %v40_v16 = vld [vmem:[%s721_s1] sm:$0xff]  ;;  %v41_v21 = vld [vmem:[%s721_s1 + $0x8] sm:$0xff]  ;;  %v16_v23 = vld [vmem:[%s720_s0 + $0x10] sm:$0xff] }
   0x8   :  { %371 = vmatpush3.msra.mxu0 %v36_v4  ;;  %445 = vmatpush3.msra.mxu1 %v36_v4  ;;  %v22_v19 = vld [vmem:[%s720_s0 + $0x40] sm:$0xff]  ;;  %v23_v24 = vld [vmem:[%s720_s0 + $0x48] sm:$0xff]  ;;  %v17_v27 = vld [vmem:[%s720_s0 + $0x18] sm:$0xff] }
   0x9   :  { %372 = vmatprep.subr.mxu0 %v460_v0  ;;  %433 = vmatprep.subr.mxu1 %v460_v0  ;;  %v44_v25 = vld [vmem:[%s721_s1 + $0x20] sm:$0xff]  ;;  %v45_v26 = vld [vmem:[%s721_s1 + $0x28] sm:$0xff]  ;;  %v24_v28 = vld [vmem:[%s720_s0 + $0x50] sm:$0xff] }
   0xa   :  { %373 = vmatpush3.msra.mxu0 %v35_v5  ;;  %446 = vmatpush3.msra.mxu1 %v35_v5  ;;  %v46_v29 = vld [vmem:[%s721_s1 + $0x30] sm:$0xff]  ;;  %v47_v30 = vld [vmem:[%s721_s1 + $0x38] sm:$0xff]  ;;  %v18_v31 = vld [vmem:[%s720_s0 + $0x20] sm:$0xff] }
   0xb   :  { %374 = vmatprep.subr.mxu0 %v460_v0  ;;  %434 = vmatprep.subr.mxu1 %v460_v0  ;;  %v25_v32 = vld [vmem:[%s720_s0 + $0x58] sm:$0xff]  ;;  %v48_v33 = vld [vmem:[%s721_s1 + $0x40] sm:$0xff]  ;;  %v49_v34 = vld [vmem:[%s721_s1 + $0x48] sm:$0xff] }
   0xc   :  { %375 = vmatpush3.msra.mxu0 %v34_v6  ;;  %447 = vmatpush3.msra.mxu1 %v34_v6  ;;  %v19_v35 = vld [vmem:[%s720_s0 + $0x28] sm:$0xff]  ;;  %v26_v36 = vld [vmem:[%s720_s0 + $0x60] sm:$0xf]  ;;  %v50_v37 = vld [vmem:[%s721_s1 + $0x50] sm:$0xff] }
   0xd   :  { %376 = vmatprep.subr.mxu0 %v460_v0  ;;  %435 = vmatprep.subr.mxu1 %v460_v0  ;;  %v51_v38 = vld [vmem:[%s721_s1 + $0x58] sm:$0xff]  ;;  %v20_v39 = vld [vmem:[%s720_s0 + $0x30] sm:$0xff]  ;;  %v52_v40 = vld [vmem:[%s721_s1 + $0x60] sm:$0xf] }
   0xe   :  { %377 = vmatpush3.msra.mxu0 %v33_v7  ;;  %448 = vmatpush3.msra.mxu1 %v33_v7 }
   0xf   :  { %378 = vmatprep.subr.mxu0 %v460_v0  ;;  %436 = vmatprep.subr.mxu1 %v460_v0 }
  0x10   :  { %379 = vmatpush3.msra.mxu0 %v32_v8  ;;  %449 = vmatpush3.msra.mxu1 %v32_v8 }
  0x11   :  { %380 = vmatprep.subr.mxu0 %v460_v0  ;;  %437 = vmatprep.subr.mxu1 %v460_v0 }
  0x12   :  { %381 = vmatpush3.msra.mxu0 %v31_v9  ;;  %450 = vmatpush3.msra.mxu1 %v31_v9 }
  0x13   :  { %382 = vmatprep.subr.mxu0 %v460_v0  ;;  %438 = vmatprep.subr.mxu1 %v460_v0 }
  0x14   :  { %383 = vmatpush3.msra.mxu0 %v30_v10  ;;  %451 = vmatpush3.msra.mxu1 %v30_v10 }
  0x15   :  { %384 = vmatprep.subr.mxu0 %v460_v0  ;;  %439 = vmatprep.subr.mxu1 %v460_v0 }
  0x16   :  { %385 = vmatpush3.msra.mxu0 %v29_v11  ;;  %452 = vmatpush3.msra.mxu1 %v29_v11 }
  0x17   :  { %386 = vmatprep.subr.mxu0 %v460_v0  ;;  %440 = vmatprep.subr.mxu1 %v460_v0 }
  0x18   :  { %387 = vmatpush3.msra.mxu0 %v28_v12  ;;  %453 = vmatpush3.msra.mxu1 %v28_v12 }
  0x19   :  { %388 = vmatprep.subr.mxu0 %v460_v0  ;;  %441 = vmatprep.subr.mxu1 %v460_v0 }
  0x1a   :  { %389 = vmatpush3.msra.mxu0 %v27_v13  ;;  %454 = vmatpush3.msra.mxu1 %v27_v13 }
  0x1b   :  { %390 = vmatprep.mubr.msk.f32.mxu0 %vm461_vm2, %v460_v0  ;;  %411 = vmatprep.mubr.msk.f32.mxu1 %vm461_vm2, %v460_v0 }
  0x1c   :  { %391 = vmatmul.mubr.msk.f32.vlgmr.msra.gmra.mxu0 %vm118_vm1, %v14_v14  ;;  %412 = vmatmul.mubr.msk.f32.vlgmr.msra.gmra.mxu1 %vm118_vm1, %v21_v15 }
  0x1d   :  { %393 = vmatprep.mubr.msk.f32.mxu0 %vm461_vm2, %v460_v0  ;;  %414 = vmatprep.mubr.msk.f32.mxu1 %vm461_vm2, %v460_v0 }
  0x1e   :  { %458 = vset.pattern.permute.xlu0 %v462_v20  ;;  %459 = vset.pattern.permute.xlu1 %v462_v20 }
  0x1f   :  { %55 = vperm.xlu0 %458, %v40_v16   ;;  %65 = vperm.xlu1 %459, %v42_v17  }
  0x20   :  { %394 = vmatmul.mubr.msk.f32.gmra.mxu0 %vm118_vm1, %v15_v18  ;;  %415 = vmatmul.mubr.msk.f32.gmra.mxu1 %vm118_vm1, %v22_v19 }
  0x21   :  { %396 = vmatprep.mubr.msk.f32.mxu0 %vm461_vm2, %v460_v0  ;;  %417 = vmatprep.mubr.msk.f32.mxu1 %vm461_vm2, %v460_v0 }
  0x23   :  { %60 = vperm.xlu0 %458, %v41_v21   ;;  %70 = vperm.xlu1 %459, %v43_v22  }
  0x24   :  { %397 = vmatmul.mubr.msk.f32.gmra.mxu0 %vm118_vm1, %v16_v23  ;;  %418 = vmatmul.mubr.msk.f32.gmra.mxu1 %vm118_vm1, %v23_v24 }
  0x25   :  { %399 = vmatprep.mubr.msk.f32.mxu0 %vm461_vm2, %v460_v0  ;;  %420 = vmatprep.mubr.msk.f32.mxu1 %vm461_vm2, %v460_v0 }
  0x27   :  { %75 = vperm.xlu0 %458, %v44_v25   ;;  %80 = vperm.xlu1 %459, %v45_v26  }
  0x28   :  { %400 = vmatmul.mubr.msk.f32.gmra.mxu0 %vm118_vm1, %v17_v27  ;;  %421 = vmatmul.mubr.msk.f32.gmra.mxu1 %vm118_vm1, %v24_v28 }
  0x29   :  { %402 = vmatprep.mubr.msk.f32.mxu0 %vm461_vm2, %v460_v0  ;;  %423 = vmatprep.mubr.msk.f32.mxu1 %vm461_vm2, %v460_v0 }
  0x2b   :  { %85 = vperm.xlu0 %458, %v46_v29   ;;  %90 = vperm.xlu1 %459, %v47_v30  }
  0x2c   :  { %403 = vmatmul.mubr.msk.f32.gmra.mxu0 %vm118_vm1, %v18_v31  ;;  %424 = vmatmul.mubr.msk.f32.gmra.mxu1 %vm118_vm1, %v25_v32 }
  0x2d   :  { %405 = vmatprep.mubr.msk.f32.mxu0 %vm461_vm2, %v460_v0  ;;  %426 = vmatprep.mubr.msk.f32.mxu1 %vm461_vm2, %v460_v0 }
  0x2f   :  { %95 = vperm.xlu0 %458, %v48_v33   ;;  %100 = vperm.xlu1 %459, %v49_v34  }
  0x30   :  { %406 = vmatmul.mubr.msk.f32.gmra.mxu0 %vm118_vm1, %v19_v35  ;;  %427 = vmatmul.mubr.msk.f32.gmra.mxu1 %vm118_vm1, %v26_v36 }
  0x31   :  { %408 = vmatprep.mubr.msk.f32.mxu0 %vm461_vm2, %v460_v0 }
  0x33   :  { %105 = vperm.xlu0 %458, %v50_v37   ;;  %110 = vperm.xlu1 %459, %v51_v38  }
  0x34   :  { %409 = vmatmul.mubr.msk.f32.gmra.mxu0 %vm118_vm1, %v20_v39 }
  0x37   :  { %115 = vperm.xlu0 %458, %v52_v40  }
  0x9a   :  { %v56_v41 = vpop.permute.xlu0 %55  ;;  %v66_v42 = vpop.permute.xlu1 %65 }
  0x9e   :  { %v61_v43 = vpop.permute.xlu0 %60  ;;  %v71_v44 = vpop.permute.xlu1 %70 }
  0xa2   :  { %v76_v45 = vpop.permute.xlu0 %75  ;;  %v81_v46 = vpop.permute.xlu1 %80 }
  0xa6   :  { %v665_v47 = vpop.permute.xlu0 %85  ;;  %v91_v48 = vpop.permute.xlu1 %90 }
  0xaa   :  { %v96_v55 = vpop.permute.xlu0 %95  ;;  %v101_v0 = vpop.permute.xlu1 %100 }
  0xae   :  { %v106_v9 = vpop.permute.xlu0 %105  ;;  %v111_v18 = vpop.permute.xlu1 %110 }
  0xb2   :  { %v116_v27 = vpop.permute.xlu0 %115 }
  0xdc   :  { %v228_v49 = vpop.f32.mrf.mxu0  ;;  %v263_v50 = vpop.f32.mrf.mxu1 }
  0xdd   :  { %v229_v51 = vadd.f32 %v228_v49, %v56_v41  ;;  %v264_v52 = vadd.f32 %v263_v50, %v91_v48 }
  0xde   :  { %v392_v53 = vpop.f32.mrf.mxu0  ;;  %v413_v54 = vpop.f32.mrf.mxu1 }
  0xdf   :  { %v292_v56 = vmax.f32 %v229_v51, 0.0  ;;  %v299_v57 = vmax.f32 %v264_v52, 0.0 }
  0xe0   :  { %v233_v58 = vpop.f32.mrf.mxu0  ;;  %v268_v59 = vpop.f32.mrf.mxu1 }
  0xe1   :  { %306 = vst.msk [vmem:[%s722_s3] sm:$0xff] %vm305_vm3, %v292_v56  ;;  %313 = vst.msk [vmem:[%s722_s3 + $0x38] sm:$0xff] %vm305_vm3, %v299_v57  ;;  %v234_v60 = vadd.f32 %v233_v58, %v61_v43  ;;  %v269_v61 = vadd.f32 %v268_v59, %v96_v55 }
  0xe2   :  { %v395_v62 = vpop.f32.mrf.mxu0  ;;  %v416_v63 = vpop.f32.mrf.mxu1 }
  0xe3   :  { %v293_v1 = vmax.f32 %v234_v60, 0.0  ;;  %v300_v2 = vmax.f32 %v269_v61, 0.0 }
  0xe4   :  { %v238_v3 = vpop.f32.mrf.mxu0  ;;  %v273_v4 = vpop.f32.mrf.mxu1 }
  0xe5   :  { %307 = vst.msk [vmem:[%s722_s3 + $0x8] sm:$0xff] %vm305_vm3, %v293_v1  ;;  %314 = vst.msk [vmem:[%s722_s3 + $0x40] sm:$0xff] %vm305_vm3, %v300_v2  ;;  %v239_v5 = vadd.f32 %v238_v3, %v66_v42  ;;  %v274_v6 = vadd.f32 %v273_v4, %v101_v0 }
  0xe6   :  { %v398_v7 = vpop.f32.mrf.mxu0  ;;  %v419_v8 = vpop.f32.mrf.mxu1 }
  0xe7   :  { %v294_v10 = vmax.f32 %v239_v5, 0.0  ;;  %v301_v11 = vmax.f32 %v274_v6, 0.0 }
  0xe8   :  { %v243_v12 = vpop.f32.mrf.mxu0  ;;  %v278_v13 = vpop.f32.mrf.mxu1 }
  0xe9   :  { %308 = vst.msk [vmem:[%s722_s3 + $0x10] sm:$0xff] %vm305_vm3, %v294_v10  ;;  %315 = vst.msk [vmem:[%s722_s3 + $0x48] sm:$0xff] %vm305_vm3, %v301_v11  ;;  %v244_v14 = vadd.f32 %v243_v12, %v71_v44  ;;  %v279_v15 = vadd.f32 %v278_v13, %v106_v9 }
  0xea   :  { %v401_v16 = vpop.f32.mrf.mxu0  ;;  %v422_v17 = vpop.f32.mrf.mxu1 }
  0xeb   :  { %v295_v19 = vmax.f32 %v244_v14, 0.0  ;;  %v302_v20 = vmax.f32 %v279_v15, 0.0 }
  0xec   :  { %v248_v21 = vpop.f32.mrf.mxu0  ;;  %v283_v22 = vpop.f32.mrf.mxu1 }
  0xed   :  { %309 = vst.msk [vmem:[%s722_s3 + $0x18] sm:$0xff] %vm305_vm3, %v295_v19  ;;  %316 = vst.msk [vmem:[%s722_s3 + $0x50] sm:$0xff] %vm305_vm3, %v302_v20  ;;  %v249_v23 = vadd.f32 %v248_v21, %v76_v45  ;;  %v284_v24 = vadd.f32 %v283_v22, %v111_v18 }
  0xee   :  { %v404_v25 = vpop.f32.mrf.mxu0  ;;  %v425_v26 = vpop.f32.mrf.mxu1 }
  0xef   :  { %v296_v28 = vmax.f32 %v249_v23, 0.0  ;;  %v303_v29 = vmax.f32 %v284_v24, 0.0 }
  0xf0   :  { %v253_v30 = vpop.f32.mrf.mxu0  ;;  %v288_v31 = vpop.f32.mrf.mxu1 }
  0xf1   :  { %310 = vst.msk [vmem:[%s722_s3 + $0x20] sm:$0xff] %vm305_vm3, %v296_v28  ;;  %317 = vst.msk [vmem:[%s722_s3 + $0x58] sm:$0xff] %vm305_vm3, %v303_v29  ;;  %v254_v32 = vadd.f32 %v253_v30, %v81_v46  ;;  %v289_v33 = vadd.f32 %v288_v31, %v116_v27 }
  0xf2   :  { %v407_v34 = vpop.f32.mrf.mxu0  ;;  %v428_v35 = vpop.f32.mrf.mxu1 }
  0xf3   :  { %v297_v36 = vmax.f32 %v254_v32, 0.0  ;;  %v304_v37 = vmax.f32 %v289_v33, 0.0 }
  0xf4   :  { %v258_v38 = vpop.f32.mrf.mxu0 }
  0xf5   :  { %311 = vst.msk [vmem:[%s722_s3 + $0x28] sm:$0xff] %vm305_vm3, %v297_v36  ;;  %v259_v39 = vadd.f32 %v258_v38, %v665_v47 }
  0xf6   :  { %319 = vst.msk [vmem:[%s722_s3 + $0x60] sm:$0xf] %vm318_vm4, %v304_v37  ;;  %v410_v40 = vpop.f32.mrf.mxu0 }
  0xf7   :  { %v298_v41 = vmax.f32 %v259_v39, 0.0 }
  0xf9   :  { %312 = vst.msk [vmem:[%s722_s3 + $0x30] sm:$0xff] %vm305_vm3, %v298_v41 }

</bundles_post_ra>
